<compile_context>
chip_gen: v7x
topology: tpu7x:2x2x1
jax: 0.10.0
libtpu: 0.0.40
codegen_flags: <defaults>
</compile_context>

<pallas_src>
import functools
import math

import jax
import jax.numpy as jnp
from jax.experimental import pallas as pl
from jax.experimental.pallas import tpu as pltpu

ARCSEC_TO_RAD = math.pi / (180.0 * 3600.0)


# ----------------------------------------------------------------------------
# Pallas kernel 1: BaseCube pixel mapping (softplus), tiled elementwise.
# ----------------------------------------------------------------------------
def _softplus_kernel(b_ref, o_ref):
    x = b_ref[...]
    # numerically stable softplus == torch.nn.Softplus default
    o_ref[...] = jnp.maximum(x, 0.0) + jnp.log1p(jnp.exp(-jnp.abs(x)))


def base_cube_forward(base_cube):
    nchan, npix, _ = base_cube.shape
    rows = nchan * npix
    x2 = base_cube.reshape(rows, npix)
    # lane-dense blocks: full last dim; row tile either full (small cube) or 512 (mult of 8)
    rt = rows if rows <= 512 else 512
    out = pl.pallas_call(
        _softplus_kernel,
        out_shape=jax.ShapeDtypeStruct((rows, npix), base_cube.dtype),
        grid_spec=pltpu.PrefetchScalarGridSpec(
            num_scalar_prefetch=0,
            grid=(pl.cdiv(rows, rt),),
            in_specs=[pl.BlockSpec((rt, npix), lambda i: (i, 0))],
            out_specs=pl.BlockSpec((rt, npix), lambda i: (i, 0)),
        ),
        compiler_params=pltpu.CompilerParams(dimension_semantics=("parallel",)),
    )(x2)
    return out.reshape(nchan, npix, npix)


# ----------------------------------------------------------------------------
# GaussConvFourier: convolve the cube with a circular Gaussian (FWHM_maj=FWHM_min)
# by multiplying its FFT with the analytic (flux-preserving) Gaussian taper.
# TODO(synk): FFT/IFFT have no Pallas TPU primitive; this stage stays in jnp.fft glue.
# ----------------------------------------------------------------------------
def gauss_conv_fourier(sky, cell_rad, fwhm_arcsec):
    nchan, npix, _ = sky.shape
    sigma_rad = fwhm_arcsec * ARCSEC_TO_RAD / (2.0 * math.sqrt(2.0 * math.log(2.0)))
    freqs = jnp.fft.fftfreq(npix, d=cell_rad)  # spatial frequency [lambda]
    uu_g = freqs[None, :]
    vv_g = freqs[:, None]
    taper = jnp.exp(
        -2.0 * (math.pi ** 2) * (sigma_rad ** 2) * (uu_g ** 2 + vv_g ** 2)
    ).astype(jnp.complex64)
    ft = jnp.fft.fft2(sky.astype(jnp.complex64), axes=(-2, -1))
    conv = jnp.fft.ifft2(ft * taper, axes=(-2, -1))
    return jnp.real(conv).astype(jnp.float32)


# ----------------------------------------------------------------------------
# Pallas kernel 2: NuFFT as a SEPARABLE exact direct non-uniform DFT.
#
#   V[c,k] = cell^2 * sum_{i,j} I[c,i,j] * exp(-2*pi*i*(u_k*l_j + v_k*m_i))
#          = cell^2 * sum_i e^{-2*pi*i*v_k*m_i} * ( sum_j I[c,i,j] * e^{-2*pi*i*u_k*l_j} )
#
#   stage 1: (nchan*npix_m, npix_l) @ (npix_l, 2*tk) MXU matmul with [cos_l | sin_l]
#   stage 2: combine with cos_m/sin_m elementwise and reduce over m (sublane reduce)
# ----------------------------------------------------------------------------
def _nufft_sep_kernel(img_ref, uu_ref, vv_ref, out_ref, *, nchan, npix, cell_rad):
    tk = uu_ref.shape[1]
    center = float(npix // 2)
    two_pi_cell = 2.0 * math.pi * float(cell_rad)  # -2*pi and cell folded together

    # pixel-index offset (p - npix//2), shared by the l- and m-axis phases
    offset = jax.lax.broadcasted_iota(jnp.int32, (npix, tk), 0).astype(jnp.float32) - center
    coef = two_pi_cell * offset                               # (npix, tk)

    # l_j = -(j - c)*cell  ->  phase_l[j,k] = -2*pi*u_k*l_j = +coef[j]*u_k
    phase_l = coef * uu_ref[...]                              # (npix, tk)
    # m_i = +(i - c)*cell  ->  phase_m[i,k] = -2*pi*v_k*m_i = -coef[i]*v_k
    phase_m = coef * (-vv_ref[...])                           # (npix, tk)

    cos_l = jnp.cos(phase_l)
    sin_l = jnp.sin(phase_l)
    cos_m = jnp.cos(phase_m)
    sin_m = jnp.sin(phase_m)

    # stage 1: one fused MXU matmul over the l (column) axis for both trig factors
    trig_l = jnp.concatenate([cos_l, sin_l], axis=1)          # (npix, 2*tk)
    a = jnp.dot(img_ref[...], trig_l,
                preferred_element_type=jnp.float32)           # (nchan*npix, 2*tk)
    a = a.reshape(nchan, npix, 2 * tk)
    a_cos = a[:, :, :tk]                                      # sum_j I*cos_l
    a_sin = a[:, :, tk:]                                      # sum_j I*sin_l

    # stage 2: combine with the m-axis trig and reduce over m (sublane axis -> XLU)
    cm = cos_m[None, :, :]
    sm = sin_m[None, :, :]
    out_ref[0, :, :] = jnp.sum(a_cos * cm - a_sin * sm, axis=1)   # real part (unscaled)
    out_ref[1, :, :] = jnp.sum(a_sin * cm + a_cos * sm, axis=1)   # imag part (unscaled)


def nufft_forward(image_cube, uu, vv, cell_rad, tk=512):
    nchan, npix, _ = image_cube.shape
    K = uu.shape[0]

    # visibility tile: multiple of 128, no larger than the (rounded-up) problem
    tk_eff = min(int(tk), ((K + 127) // 128) * 128)
    num_tiles = pl.cdiv(K, tk_eff)
    k_pad = num_tiles * tk_eff

    uu_p = jnp.pad(uu.astype(jnp.float32), (0, k_pad - K)).reshape(1, k_pad)
    vv_p = jnp.pad(vv.astype(jnp.float32), (0, k_pad - K)).reshape(1, k_pad)
    img2d = image_cube.reshape(nchan * npix, npix).astype(jnp.float32)

    kern = functools.partial(
        _nufft_sep_kernel, nchan=nchan, npix=npix, cell_rad=float(cell_rad)
    )

    out = pl.pallas_call(
        kern,
        out_shape=jax.ShapeDtypeStruct((2, nchan, k_pad), jnp.float32),
        grid_spec=pltpu.PrefetchScalarGridSpec(
            num_scalar_prefetch=0,
            grid=(num_tiles,),
            in_specs=[
                pl.BlockSpec((nchan * npix, npix), lambda k: (0, 0)),  # image (resident)
                pl.BlockSpec((1, tk_eff), lambda k: (0, k)),           # uu tile
                pl.BlockSpec((1, tk_eff), lambda k: (0, k)),           # vv tile
            ],
            out_specs=pl.BlockSpec((2, nchan, tk_eff), lambda k: (0, 0, k)),
        ),
        compiler_params=pltpu.CompilerParams(
            dimension_semantics=("parallel",),
            vmem_limit_bytes=64 * 1024 * 1024,
        ),
    )(img2d, uu_p, vv_p)

    cell2 = float(cell_rad) ** 2
    re = out[0, :, :K]
    im = out[1, :, :K]
    return cell2 * (re + 1j * im)   # complex64, shape (nchan, nvis); padded slots dropped


# ----------------------------------------------------------------------------
# Full forward (BaseCube -> GaussConvFourier -> ImageCube -> NuFFT), jitted.
# ----------------------------------------------------------------------------
@functools.partial(jax.jit, static_argnames=("cell_rad", "fwhm_arcsec"))
def net_forward(base_cube, uu, vv, *, cell_rad, fwhm_arcsec):
    x = base_cube_forward(base_cube)                 # BaseCube (Pallas)
    x = gauss_conv_fourier(x, cell_rad, fwhm_arcsec) # GaussConvFourier (jnp.fft glue)
    x = x                                            # ImageCube: identity pass-through
    vis = nufft_forward(x, uu, vv, cell_rad)         # NuFFT (Pallas separable DFT)
    return vis


class NetPallas:
    def __init__(self, cell_size_arcsec, npix, nchan=1, FWHM=0.05,
                 obsid_dict=None, fixed_amp_index=0, key=None):
        self.cell_rad = cell_size_arcsec * ARCSEC_TO_RAD
        self.npix = npix
        self.nchan = nchan
        self.FWHM = FWHM
        self.fixed_amp_index = fixed_amp_index

        # --- buffers / parameters mirroring torch __init__ (unused by forward) ---
        ddid2obsid = []
        for obsid, ddids in obsid_dict.items():
            for ddid in ddids:
                ddid2obsid.append(obsid)
        self.ddid2obsid = jnp.asarray(ddid2obsid, dtype=jnp.int32)
        self.log10_amp_factors = jnp.zeros((len(obsid_dict) - 1,), jnp.float32)
        self.zero_val = jnp.zeros((1,), jnp.float32)
        self.log10_sigma_factors = jnp.zeros((len(ddid2obsid),), jnp.float32)

        # --- BaseCube parameter: (nchan, npix, npix), deterministic init ---
        self.base_cube = 0.1 * jax.random.normal(
            key, (nchan, npix, npix), dtype=jnp.float32
        )
        # Pixel sky coordinates are generated in-kernel from the pixel index
        # (row -> m = +(i - npix//2)*cell, col -> l = -(j - npix//2)*cell), so no
        # lane-sparse (npix^2, 1) coordinate buffers are needed.

    def forward(self, uu, vv):
        return net_forward(self.base_cube, uu, vv,
                           cell_rad=self.cell_rad, fwhm_arcsec=self.FWHM)


if __name__ == "__main__":
    key = jax.random.PRNGKey(0)
    k_cube, k_uu, k_vv = jax.random.split(key, 3)

    npix = 16
    nchan = 1
    nvis = 128
    cell_size_arcsec = 0.005
    obsid_dict = {0: [0, 1], 1: [2], 2: [3, 4]}

    net = NetPallas(cell_size_arcsec, npix, nchan=nchan, FWHM=0.05,
                    obsid_dict=obsid_dict, key=k_cube)

    max_uv = 1.0 / (4.0 * net.cell_rad)  # stay within the grid's Nyquist range
    uu = jax.random.uniform(k_uu, (nvis,), jnp.float32, -max_uv, max_uv)
    vv = jax.random.uniform(k_vv, (nvis,), jnp.float32, -max_uv, max_uv)

    vis = net.forward(uu, vv)
    vis = jax.block_until_ready(vis)

    # ---- correctness check vs. a plain-JAX exact (non-separable) direct DFT ----
    x_ref = jax.nn.softplus(net.base_cube)
    x_ref = gauss_conv_fourier(x_ref, net.cell_rad, net.FWHM)
    idx = jnp.arange(npix, dtype=jnp.float32) - (npix // 2)
    l_ax = -(idx * net.cell_rad)
    m_ax = idx * net.cell_rad
    l_flat = jnp.broadcast_to(l_ax[None, :], (npix, npix)).reshape(-1)
    m_flat = jnp.broadcast_to(m_ax[:, None], (npix, npix)).reshape(-1)
    phase = -2.0 * jnp.pi * (uu[None, :] * l_flat[:, None] + vv[None, :] * m_flat[:, None])
    vis_ref = (net.cell_rad ** 2) * (
        x_ref.reshape(nchan, -1) @ jnp.exp(1j * phase).astype(jnp.complex64)
    )
    rel_err = jnp.max(jnp.abs(vis - vis_ref)) / (jnp.max(jnp.abs(vis_ref)) + 1e-30)
    assert float(rel_err) < 1e-3, f"relative error too large: {float(rel_err)}"

    assert vis.shape == (nchan, nvis)
    assert jnp.iscomplexobj(vis)
    assert bool(jnp.all(jnp.isfinite(vis.real))) and bool(jnp.all(jnp.isfinite(vis.imag)))
    print("KERNEL_OK")
</pallas_src>

<mosaic_0001>
module attributes {stable_mosaic.version = 11 : i64} {
  func.func @_softplus_kernel(%arg0: i32, %arg1: memref<16x16xf32, #tpu.memory_space<vmem>>, %arg2: memref<16x16xf32, #tpu.memory_space<vmem>>) attributes {dimension_semantics = [#tpu.dimension_semantics<parallel>], iteration_bounds = array<i64: 1>, scalar_prefetch = 0 : i64, scratch_operands = 0 : i64, tpu.core_type = #tpu.core_type<tc>, window_params = [{transform_indices = @transform_0, window_bounds = array<i64: 16, 16>}, {transform_indices = @transform_1, window_bounds = array<i64: 16, 16>}]} {
    %c0 = arith.constant 0 : index
    %c0_0 = arith.constant 0 : index
    %0 = vector.load %arg1[%c0, %c0_0] : memref<16x16xf32, #tpu.memory_space<vmem>>, vector<16x16xf32>
    %cst = arith.constant 0.000000e+00 : f32
    %1 = vector.broadcast %cst : f32 to vector<16x16xf32>
    %2 = arith.maximumf %0, %1 : vector<16x16xf32>
    %3 = math.absf %0 : vector<16x16xf32>
    %cst_1 = arith.constant 0.000000e+00 : f32
    %4 = vector.broadcast %cst_1 : f32 to vector<16x16xf32>
    %5 = arith.subf %4, %3 : vector<16x16xf32>
    %6 = math.exp %5 : vector<16x16xf32>
    %7 = math.log1p %6 : vector<16x16xf32>
    %8 = arith.addf %2, %7 : vector<16x16xf32>
    %c0_2 = arith.constant 0 : index
    %c0_3 = arith.constant 0 : index
    %9 = vector.load %arg2[%c0_2, %c0_3] : memref<16x16xf32, #tpu.memory_space<vmem>>, vector<16x16xf32>
    tpu.vector_store %arg2[%c0_2, %c0_3], %8 {strides = array<i32>} : memref<16x16xf32, #tpu.memory_space<vmem>>, vector<16x16xf32>,
    return
  }
  func.func @transform_0(%arg0: i32) -> (i32, i32) {
    %c0_i32 = arith.constant 0 : i32
    %c0_i32_0 = arith.constant 0 : i32
    return %arg0, %c0_i32 : i32, i32
  }
  func.func @transform_1(%arg0: i32) -> (i32, i32) {
    %c0_i32 = arith.constant 0 : i32
    %c0_i32_0 = arith.constant 0 : i32
    return %arg0, %c0_i32 : i32, i32
  }
}

module attributes {stable_mosaic.version = 11 : i64} {
  func.func @_nufft_sep_kernel(%arg0: i32, %arg1: memref<16x16xf32, #tpu.memory_space<vmem>>, %arg2: memref<1x128xf32, #tpu.memory_space<vmem>>, %arg3: memref<1x128xf32, #tpu.memory_space<vmem>>, %arg4: memref<2x1x128xf32, #tpu.memory_space<vmem>>) attributes {dimension_semantics = [#tpu.dimension_semantics<parallel>], iteration_bounds = array<i64: 1>, scalar_prefetch = 0 : i64, scratch_operands = 0 : i64, tpu.core_type = #tpu.core_type<tc>, window_params = [{pipeline_mode = #tpu.pipeline_mode<synchronous>, transform_indices = @transform_0, window_bounds = array<i64: 16, 16>}, {transform_indices = @transform_1, window_bounds = array<i64: 1, 128>}, {transform_indices = @transform_2, window_bounds = array<i64: 1, 128>}, {transform_indices = @transform_3, window_bounds = array<i64: 2, 1, 128>}]} {
    %0 = tpu.iota {dimensions = array<i32: 0>} : vector<16x128xi32>
    %1 = arith.sitofp %0 : vector<16x128xi32> to vector<16x128xf32>
    %cst = arith.constant 8.000000e+00 : f32
    %2 = vector.broadcast %cst : f32 to vector<16x128xf32>
    %3 = arith.subf %1, %2 : vector<16x128xf32>
    %cst_0 = arith.constant 1.52308715E-7 : f32
    %4 = vector.broadcast %cst_0 : f32 to vector<16x128xf32>
    %5 = arith.mulf %4, %3 : vector<16x128xf32>
    %c0 = arith.constant 0 : index
    %c0_1 = arith.constant 0 : index
    %6 = vector.load %arg2[%c0, %c0_1] : memref<1x128xf32, #tpu.memory_space<vmem>>, vector<1x128xf32>
    %7 = vector.broadcast %6 : vector<1x128xf32> to vector<16x128xf32>
    %8 = arith.mulf %5, %7 : vector<16x128xf32>
    %c0_2 = arith.constant 0 : index
    %c0_3 = arith.constant 0 : index
    %9 = vector.load %arg3[%c0_2, %c0_3] : memref<1x128xf32, #tpu.memory_space<vmem>>, vector<1x128xf32>
    %cst_4 = arith.constant 0.000000e+00 : f32
    %10 = vector.broadcast %cst_4 : f32 to vector<1x128xf32>
    %11 = arith.subf %10, %9 : vector<1x128xf32>
    %12 = vector.broadcast %11 : vector<1x128xf32> to vector<16x128xf32>
    %13 = arith.mulf %5, %12 : vector<16x128xf32>
    %14 = math.cos %8 : vector<16x128xf32>
    %15 = math.sin %8 : vector<16x128xf32>
    %16 = math.cos %13 : vector<16x128xf32>
    %17 = math.sin %13 : vector<16x128xf32>
    %18 = tpu.concatenate %14, %15 in 1 : vector<16x128xf32>, vector<16x128xf32> -> vector<16x256xf32>
    %c0_5 = arith.constant 0 : index
    %c0_6 = arith.constant 0 : index
    %19 = vector.load %arg1[%c0_5, %c0_6] : memref<16x16xf32, #tpu.memory_space<vmem>>, vector<16x16xf32>
    %cst_7 = arith.constant dense<0.000000e+00> : vector<16x256xf32>
    %20 = tpu.matmul %19, %18, %cst_7 {dimension_numbers = #tpu.dot_dimension_numbers<[1], [0], [0], [1], [0, 0, 1, 1], [], []>} : vector<16x16xf32>, vector<16x256xf32>, vector<16x256xf32> -> vector<16x256xf32>
    %21 = vector.shape_cast %20 : vector<16x256xf32> to vector<1x16x256xf32>
    %22 = vector.extract_strided_slice %21 {offsets = [0, 0, 0], sizes = [1, 16, 128], strides = [1, 1, 1]} : vector<1x16x256xf32> to vector<1x16x128xf32>
    %23 = vector.extract_strided_slice %21 {offsets = [0, 0, 128], sizes = [1, 16, 128], strides = [1, 1, 1]} : vector<1x16x256xf32> to vector<1x16x128xf32>
    %24 = vector.shape_cast %16 : vector<16x128xf32> to vector<1x16x128xf32>
    %25 = vector.shape_cast %17 : vector<16x128xf32> to vector<1x16x128xf32>
    %26 = arith.mulf %22, %24 : vector<1x16x128xf32>
    %27 = arith.mulf %23, %25 : vector<1x16x128xf32>
    %28 = arith.subf %26, %27 : vector<1x16x128xf32>
    %cst_8 = arith.constant dense<0.000000e+00> : vector<1x128xf32>
    %29 = vector.multi_reduction <add>, %28, %cst_8 [1] : vector<1x16x128xf32> to vector<1x128xf32>
    %c0_9 = arith.constant 0 : index
    %c0_10 = arith.constant 0 : index
    %c0_11 = arith.constant 0 : index
    %30 = vector.load %arg4[%c0_9, %c0_10, %c0_11] : memref<2x1x128xf32, #tpu.memory_space<vmem>>, vector<1x1x128xf32>
    %31 = vector.shape_cast %30 : vector<1x1x128xf32> to vector<1x128xf32>
    %32 = vector.shape_cast %29 : vector<1x128xf32> to vector<1x1x128xf32>
    tpu.vector_store %arg4[%c0_9, %c0_10, %c0_11], %32 {strides = array<i32>} : memref<2x1x128xf32, #tpu.memory_space<vmem>>, vector<1x1x128xf32>,
    %33 = arith.mulf %23, %24 : vector<1x16x128xf32>
    %34 = arith.mulf %22, %25 : vector<1x16x128xf32>
    %35 = arith.addf %33, %34 : vector<1x16x128xf32>
    %cst_12 = arith.constant dense<0.000000e+00> : vector<1x128xf32>
    %36 = vector.multi_reduction <add>, %35, %cst_12 [1] : vector<1x16x128xf32> to vector<1x128xf32>
    %c1 = arith.constant 1 : index
    %c0_13 = arith.constant 0 : index
    %c0_14 = arith.constant 0 : index
    %37 = vector.load %arg4[%c1, %c0_13, %c0_14] : memref<2x1x128xf32, #tpu.memory_space<vmem>>, vector<1x1x128xf32>
    %38 = vector.shape_cast %37 : vector<1x1x128xf32> to vector<1x128xf32>
    %39 = vector.shape_cast %36 : vector<1x128xf32> to vector<1x1x128xf32>
    tpu.vector_store %arg4[%c1, %c0_13, %c0_14], %39 {strides = array<i32>} : memref<2x1x128xf32, #tpu.memory_space<vmem>>, vector<1x1x128xf32>,
    return
  }
  func.func @transform_0(%arg0: i32) -> (i32, i32) {
    %c0_i32 = arith.constant 0 : i32
    %c0_i32_0 = arith.constant 0 : i32
    %c0_i32_1 = arith.constant 0 : i32
    return %c0_i32, %c0_i32_0 : i32, i32
  }
  func.func @transform_1(%arg0: i32) -> (i32, i32) {
    %c0_i32 = arith.constant 0 : i32
    %c0_i32_0 = arith.constant 0 : i32
    return %c0_i32, %arg0 : i32, i32
  }
  func.func @transform_2(%arg0: i32) -> (i32, i32) {
    %c0_i32 = arith.constant 0 : i32
    %c0_i32_0 = arith.constant 0 : i32
    return %c0_i32, %arg0 : i32, i32
  }
  func.func @transform_3(%arg0: i32) -> (i32, i32, i32) {
    %c0_i32 = arith.constant 0 : i32
    %c0_i32_0 = arith.constant 0 : i32
    %c0_i32_1 = arith.constant 0 : i32
    return %c0_i32, %c0_i32_0, %arg0 : i32, i32, i32
  }
}

</mosaic_0001>

<bundles_post_ra>
// kernel: net_forward.2
= control target key start
LH: loop header
LB: loop body
LE: loop exit
PB: predicated region body
PF: predicated region fallthrough
CT: control target
= control target key end

     0   :  { %6 = vsyncpa [#allocation3], 0  ;;  %s97_s6 = smov [#allocation2]   ;;  %s128_s0 = inlined_call_operand.hbm [shape: f32[16,16], index: 0, kind: input, shape index: {}]   ;;  %s129_s1 = inlined_call_operand.vmem [shape: f32[16,16], index: 1, kind: output, shape index: {}]  }
   0x1   :  { %s12_s7 = sshll.u32 %s97_s6, 4  ;;  %s73_s10 = scalar_lea.hbm %s128_s0, 256  ;;  %s13_s7 = int_to_ptr.vmem [resolvable:$true] %s12_s7 }
   0x2   :  { %p74_p0 = scmp.ne.s32.totalorder %s128_s0, %s73_s10  ;;  %p77_p1 = scmp.lt.u32.totalorder %s73_s10, %s128_s0 }
   0x4   :  { %p79_p2 = pnand %p77_p1, %p74_p0 }
   0x6   :  { %82 = shalt.err (!%p79_p2)
}
   0x7   :  { %s83_s15 = scalar_lea.vmem %s13_s7, 256  ;;  %p88_p4 = scmp.lt.s32.totalorder %s13_s7, %s13_s7 }
   0x8   :  { %p84_p3 = scmp.ne.s32.totalorder %s13_s7, %s83_s15  ;;  %p89_p5 = scmp.lt.s32.totalorder %s83_s15, %s83_s15 }
   0xa   :  { %p90_p6 = por %p89_p5, %p88_p4 }
   0xc   :  { %p91_p7 = pnand %p90_p6, %p84_p3 }
   0xe   :  { %94 = shalt.err (!%p91_p7)
}
   0xf   :  { %s98_s16 = smov 128   ;;  %s99_s17 = smov 8  }
  0x10   :  { %18 = dma.hbm_to_vmem [thread:$0]  %s128_s0, 256, %s13_s7, [#allocation3], %s98_s16, %s98_s16, %s99_s17  }
  0x11   :  { %95 = dma.done.wait [#allocation3], 256  }
  0x12   :  { %96 = vsyncadd [#allocation3], 4294967040  ;;  %v22_v0 = vld [vmem:[#allocation2] sm:$0xff]  ;;  %v23_v1 = vld [vmem:[#allocation2 + $0x8] sm:$0xff]  ;;  %vm54_vm2 = vcmask 130048  }
  0x13   :  { %v26_v2 = vand.u32 2147483647, %v22_v0  ;;  %v27_v3 = vand.u32 2147483647, %v23_v1  ;;  %v24_v20 = vmax.f32 %v22_v0, 0.0  ;;  %v25_v24 = vmax.f32 %v23_v1, 0.0 }
  0x15   :  { %v28_v4 = vsub.f32 0.0, %v26_v2  ;;  %v29_v5 = vsub.f32 0.0, %v27_v3 }
  0x17   :  { %v30_v6 = vmul.f32 1.442695, %v28_v4  ;;  %v32_v7 = vmul.f32 1.442695, %v29_v5 }
  0x19   :  { %65 = vpow2.f32 %v30_v6 }
  0x1a   :  { %67 = vpow2.f32 %v32_v7 }
  0x23   :  { %v66_v8 = vpop.eup %65 }
  0x24   :  { %v68_v9 = vpop.eup %67  ;;  %v34_v10 = vadd.f32 1.0, %v66_v8  ;;  %v37_v12 = vmul.f32 -0.5, %v66_v8  ;;  %v40_v15 = vand.u32 2147483647, %v66_v8 }
  0x25   :  { %v43_v11 = vadd.f32 1.0, %v68_v9  ;;  %v46_v13 = vmul.f32 -0.5, %v68_v9  ;;  %v49_v17 = vand.u32 2147483647, %v68_v9 }
  0x26   :  { %69 = vlog2.f32 %v34_v10  ;;  %v38_v14 = vadd.f32 1.0, %v37_v12  ;;  %vm41_vm0 = vcmp.lt.f32.partialorder %v40_v15, 0.0004427343 }
  0x27   :  { %71 = vlog2.f32 %v43_v11  ;;  %v47_v16 = vadd.f32 1.0, %v46_v13  ;;  %vm50_vm1 = vcmp.lt.f32.partialorder %v49_v17, 0.0004427343 }
  0x28   :  { %v39_v18 = vmul.f32 %v66_v8, %v38_v14 }
  0x29   :  { %v48_v21 = vmul.f32 %v68_v9, %v47_v16 }
  0x30   :  { %v70_v19 = vpop.eup %69 }
  0x31   :  { %v72_v22 = vpop.eup %71  ;;  %v36_v23 = vmul.f32 0.6931472, %v70_v19 }
  0x32   :  { %v45_v25 = vmul.f32 0.6931472, %v72_v22 }
  0x33   :  { %v42_v26 = vsel %vm41_vm0, %v39_v18, %v36_v23 }
  0x34   :  { %v52_v27 = vadd.f32 %v42_v26, %v24_v20  ;;  %v51_v28 = vsel %vm50_vm1, %v48_v21, %v45_v25 }
  0x35   :  { %v53_v29 = vadd.f32 %v51_v28, %v25_v24 }
  0x36   :  { %55 = vst.msk [vmem:[%s129_s1] sm:$0xff] %vm54_vm2, %v52_v27 }
  0x37   :  { %56 = vst.msk [vmem:[%s129_s1 + $0x8] sm:$0xff] %vm54_vm2, %v53_v29 }
  0x38   :  { %61 = vsyncpa [#allocation3], 1 }

// kernel: custom-call
= control target key start
LH: loop header
LB: loop body
LE: loop exit
PB: predicated region body
PF: predicated region fallthrough
CT: control target
= control target key end

     0   :  { %s126_s0 = inlined_call_operand.vmem [shape: f32[1,128], index: 0, kind: input, shape index: {}]   ;;  %s127_s1 = inlined_call_operand.vmem [shape: f32[1,128], index: 1, kind: input, shape index: {}]   ;;  %s128_s2 = inlined_call_operand.hbm [shape: c64[1,128], index: 2, kind: output, shape index: {}]  }
   0x1   :  { %s87_s11 = scalar_lea.hbm %s128_s2, 16 }
   0x2   :  { %4 = vsyncpa [#allocation0], 0  ;;  %s5_s14 = sshll.u32 %s126_s0, 4  ;;  %s6_s14 = int_to_ptr.vmem [resolvable:$true] %s5_s14 }
   0x3   :  { %s18_s15 = scalar_lea.vmem %s6_s14, 16  ;;  %p23_p1 = scmp.lt.s32.totalorder %s6_s14, %s6_s14 }
   0x4   :  { %p19_p0 = scmp.ne.s32.totalorder %s6_s14, %s18_s15  ;;  %p24_p2 = scmp.lt.s32.totalorder %s18_s15, %s18_s15 }
   0x6   :  { %p25_p3 = por %p24_p2, %p23_p1 }
   0x8   :  { %p26_p4 = pnand %p25_p3, %p19_p0 }
   0xa   :  { %29 = shalt.err (!%p26_p4)  }
   0xb   :  { %p31_p5 = scmp.ne.s32.totalorder %s128_s2, %s87_s11  ;;  %s32_s0 = scalar_lea.hbm %s128_s2, 32 }
   0xc   :  { %p33_p6 = scmp.lt.u32.totalorder %s32_s0, %s87_s11  ;;  %p34_p7 = scmp.lt.u32.totalorder %s87_s11, %s128_s2 }
   0xe   :  { %p35_p8 = por %p34_p7, %p33_p6 }
  0x10   :  { %p36_p9 = pnand %p35_p8, %p31_p5 }
  0x12   :  { %39 = shalt.err (!%p36_p9)  }
  0x13   :  { %8 = dma.vmem_to_hbm [thread:$0]  %s6_s14, 16, %s128_s2, [#allocation0] }
  0x14   :  { %65 = dma.done.wait [#allocation0], 16  }
  0x15   :  { %66 = vsyncadd [#allocation0], 4294967280 }
  0x16   :  { %10 = vsyncpa [#allocation0], 1 }
  0x17   :  { %11 = vsyncpa [#allocation1], 0  ;;  %s12_s28 = sshll.u32 %s127_s1, 4  ;;  %s13_s28 = int_to_ptr.vmem [resolvable:$true] %s12_s28 }
  0x18   :  { %s40_s29 = scalar_lea.vmem %s13_s28, 16  ;;  %p45_p11 = scmp.lt.s32.totalorder %s13_s28, %s13_s28 }
  0x19   :  { %p41_p10 = scmp.ne.s32.totalorder %s13_s28, %s40_s29  ;;  %p46_p12 = scmp.lt.s32.totalorder %s40_s29, %s40_s29 }
  0x1b   :  { %p47_p13 = por %p46_p12, %p45_p11 }
  0x1d   :  { %p48_p0 = pnand %p47_p13, %p41_p10 }
  0x1f   :  { %51 = shalt.err (!%p48_p0)  }
  0x20   :  { %p53_p1 = scmp.ne.s32.totalorder %s87_s11, %s32_s0  ;;  %p56_p2 = scmp.lt.u32.totalorder %s32_s0, %s32_s0 }
  0x22   :  { %p57_p3 = por %p56_p2, %p34_p7 }
  0x24   :  { %p59_p4 = por %p57_p3, %p33_p6 }
  0x26   :  { %p60_p5 = pnand %p59_p4, %p53_p1 }
  0x28   :  { %63 = shalt.err (!%p60_p5)  }
  0x29   :  { %15 = dma.vmem_to_hbm [thread:$0]  %s13_s28, 16, %s87_s11, [#allocation1] }
  0x2a   :  { %67 = dma.done.wait [#allocation1], 16  }
  0x2b   :  { %68 = vsyncadd [#allocation1], 4294967280 }
  0x2c   :  { %17 = vsyncpa [#allocation1], 1 }

// kernel: net_forward.3
= control target key start
LH: loop header
LB: loop body
LE: loop exit
PB: predicated region body
PF: predicated region fallthrough
CT: control target
= control target key end

     0   :  { %8 = vsyncpa [#allocation3], 0  ;;  %s1571_s0 = inlined_call_operand.hbm [shape: f32[16,16], index: 0, kind: input, shape index: {}]   ;;  %s1572_s1 = inlined_call_operand.hbm [shape: f32[1,128], index: 1, kind: input, shape index: {}]   ;;  %s1573_s2 = inlined_call_operand.hbm [shape: f32[1,128], index: 2, kind: input, shape index: {}]   ;;  %s1574_s3 = inlined_call_operand.hbm [shape: f32[2,1,128], index: 3, kind: output, shape index: {}]  }
   0x1   :  { %9 = vsyncpa [#allocation6], 0 }
   0x2   :  { %10 = vsyncpa [#allocation4], 0  ;;  %s1225_s12 = smov [#allocation5]   ;;  %s1226_s14 = smov [#allocation2]  }
   0x3   :  { %s29_s13 = sshll.u32 %s1225_s12, 4  ;;  %s16_s15 = sshll.u32 %s1226_s14, 4  ;;  %s30_s13 = int_to_ptr.vmem [resolvable:$true] %s29_s13  ;;  %s1260_s15 = int_to_ptr.vmem [resolvable:$true] %s16_s15 }
   0x4   :  { %s1131_s18 = scalar_lea.hbm %s1572_s1, 16 }
   0x5   :  { %p1132_p0 = scmp.ne.s32.totalorder %s1572_s1, %s1131_s18  ;;  %p1135_p1 = scmp.lt.u32.totalorder %s1131_s18, %s1572_s1 }
   0x7   :  { %p1137_p2 = pnand %p1135_p1, %p1132_p0 }
   0x9   :  { %1140 = shalt.err (!%p1137_p2)
}
   0xa   :  { %s1141_s23 = scalar_lea.vmem %s30_s13, 16  ;;  %s1145_s24 = scalar_lea.vmem %s30_s13, 32 }
   0xb   :  { %p1142_p3 = scmp.ne.s32.totalorder %s30_s13, %s1141_s23  ;;  %p1146_p4 = scmp.lt.s32.totalorder %s30_s13, %s30_s13 }
   0xc   :  { %p1147_p5 = scmp.lt.s32.totalorder %s1145_s24, %s1141_s23 }
   0xe   :  { %p1148_p6 = por %p1147_p5, %p1146_p4 }
  0x10   :  { %p1149_p7 = pnand %p1148_p6, %p1142_p3 }
  0x12   :  { %1152 = shalt.err (!%p1149_p7)
}
  0x13   :  { %32 = dma.hbm_to_vmem [thread:$0]  %s1572_s1, 16, %s30_s13, [#allocation6]  }
  0x14   :  { %s1153_s29 = scalar_lea.hbm %s1571_s0, 256 }
  0x15   :  { %p1154_p8 = scmp.ne.s32.totalorder %s1571_s0, %s1153_s29  ;;  %p1157_p9 = scmp.lt.u32.totalorder %s1153_s29, %s1571_s0 }
  0x17   :  { %p1159_p10 = pnand %p1157_p9, %p1154_p8 }
  0x19   :  { %1162 = shalt.err (!%p1159_p10)
}
  0x1a   :  { %s1163_s7 = scalar_lea.vmem %s1260_s15, 256  ;;  %p1168_p12 = scmp.lt.s32.totalorder %s1260_s15, %s1260_s15 }
  0x1b   :  { %p1164_p11 = scmp.ne.s32.totalorder %s1260_s15, %s1163_s7  ;;  %p1169_p13 = scmp.lt.s32.totalorder %s1163_s7, %s1163_s7 }
  0x1d   :  { %p1170_p0 = por %p1169_p13, %p1168_p12 }
  0x1f   :  { %p1171_p1 = pnand %p1170_p0, %p1164_p11 }
  0x21   :  { %1174 = shalt.err (!%p1171_p1)
}
  0x22   :  { %s1227_s1 = smov 128   ;;  %s1228_s8 = smov 8  }
  0x23   :  { %22 = dma.hbm_to_vmem [thread:$0]  %s1571_s0, 256, %s1260_s15, [#allocation3], %s1227_s1, %s1227_s1, %s1228_s8  }
  0x24   :  { %s1229_s11 = smov [#allocation7]   ;;  %s1175_s16 = scalar_lea.hbm %s1573_s2, 16 }
  0x25   :  { %s39_s12 = sshll.u32 %s1229_s11, 4  ;;  %p1176_p2 = scmp.ne.s32.totalorder %s1573_s2, %s1175_s16  ;;  %s40_s12 = int_to_ptr.vmem [resolvable:$true] %s39_s12 }
  0x26   :  { %p1179_p3 = scmp.lt.u32.totalorder %s1175_s16, %s1573_s2 }
  0x28   :  { %p1181_p4 = pnand %p1179_p3, %p1176_p2 }
  0x2a   :  { %1184 = shalt.err (!%p1181_p4)
}
  0x2b   :  { %s1185_s21 = scalar_lea.vmem %s40_s12, 16  ;;  %s1189_s0 = scalar_lea.vmem %s40_s12, 32 }
  0x2c   :  { %p1186_p5 = scmp.ne.s32.totalorder %s40_s12, %s1185_s21  ;;  %p1190_p6 = scmp.lt.s32.totalorder %s40_s12, %s40_s12 }
  0x2d   :  { %p1191_p7 = scmp.lt.s32.totalorder %s1189_s0, %s1185_s21 }
  0x2f   :  { %p1192_p8 = por %p1191_p7, %p1190_p6 }
  0x31   :  { %p1193_p9 = pnand %p1192_p8, %p1186_p5 }
  0x33   :  { %1196 = shalt.err (!%p1193_p9)
}
  0x34   :  { %42 = dma.hbm_to_vmem [thread:$0]  %s1573_s2, 16, %s40_s12, [#allocation6]  }
  0x35   :  { %1219 = dma.done.wait [#allocation3], 256  }
  0x36   :  { %1220 = vsyncadd [#allocation3], 4294967040 }
  0x37   :  { %1221 = dma.done.wait [#allocation6], 32  }
  0x38   :  { %1222 = vsyncadd [#allocation6], 4294967264  ;;  %v52_v0 = vlaneseq  ;;  %v1230_v2 = vmov 0.0   ;;  %v1043_v7 = vld [vmem:[#allocation5] ss:$0 sm:$0xff]  ;;  %s1237_s2 = smov [#allocation8]  }
  0x39   :  { %981 = vmatprep.mubr.f32.mxu0 %v1230_v2  ;;  %987 = vmatprep.mubr.f32.mxu1 %v1230_v2  ;;  %v1231_v32 = vmov 683565275   ;;  %v1232_v34 = vmov 2475754826   ;;  %v1233_v36 = vmov 2131351028  }
  0x3a   :  { %v1303_v1 = vshrl.u32 %v52_v0, 7  ;;  %v1234_v38 = vmov 2102212464   ;;  %v1235_v40 = vmov 920167782   ;;  %s1028_s23 = sshll.u32 %s1237_s2, 4  ;;  %s1029_s23 = int_to_ptr.vmem [resolvable:$true] %s1028_s23 }
  0x3b   :  { %v1236_v47 = vmov 1326507024   ;;  %s1197_s24 = scalar_lea.vmem %s1029_s23, 32  ;;  %p1202_p11 = scmp.lt.s32.totalorder %s1029_s23, %s1029_s23 }
  0x3c   :  { %v54_v3 = vadd.s32 8, %v1303_v1  ;;  %v55_v4 = vcvt.s32.f32 %v1303_v1  ;;  %p1198_p10 = scmp.ne.s32.totalorder %s1029_s23, %s1197_s24  ;;  %p1203_p12 = scmp.lt.s32.totalorder %s1197_s24, %s1197_s24 }
  0x3e   :  { %v56_v5 = vcvt.s32.f32 %v54_v3  ;;  %v1041_v6 = vadd.f32 -8.0, %v55_v4  ;;  %p1204_p13 = por %p1203_p12, %p1202_p11 }
  0x40   :  { %v1042_v8 = vadd.f32 -8.0, %v56_v5  ;;  %v1307_v9 = vmul.f32 1.5230871e-07, %v1041_v6  ;;  %p1205_p0 = pnand %p1204_p13, %p1198_p10 }
  0x42   :  { %v1309_v10 = vmul.f32 1.5230871e-07, %v1042_v8  ;;  %v1312_v11 = vmul.f32 %v1043_v7, %v1307_v9 }
  0x44   :  { %v1315_v12 = vmul.f32 %v1043_v7, %v1309_v10  ;;  %v80_v13 = vand.u32 2147483647, %v1312_v11  ;;  %v83_v14 = vand.u32 2139095040, %v1312_v11  ;;  %vm82_vm14 = vcmp.lt.s32.totalorder %v1312_v11, 0 }
  0x46   :  { %v84_v15 = vshrl.u32 %v83_v14, 23  ;;  %v87_v16 = vand.u32 8388607, %v80_v13  ;;  %v183_v17 = vand.u32 2147483647, %v1315_v12  ;;  %v186_v18 = vand.u32 2139095040, %v1315_v12 }
  0x47   :  { %vm1396_vm15 = vcmp.le.f32.partialorder %v80_v13, 0.7853982 }
  0x48   :  { %v1044_v19 = vadd.s32 4294967169, %v84_v15  ;;  %v187_v20 = vshrl.u32 %v186_v18, 23  ;;  %v88_v22 = vor.u32 8388608, %v87_v16  ;;  %v1325_v24 = vand.u32 8388607, %v183_v17 }
  0x4a   :  { %v90_v21 = vadd.s32 1, %v1044_v19  ;;  %v1048_v23 = vadd.s32 4294967169, %v187_v20  ;;  %v1327_v29 = vshll.u32 %v88_v22, 8  ;;  %v191_v30 = vor.u32 8388608, %v1325_v24 }
  0x4c   :  { %vm91_vm0 = vcmp.gt.s32.totalorder %v90_v21, 0  ;;  %v193_v26 = vadd.s32 1, %v1048_v23 }
  0x4d   :  { %v92_v25 = vsel %vm91_vm0, %v90_v21, 0  ;;  %vm185_vm0 = vcmp.lt.s32.totalorder %v1315_v12, 0 }
  0x4e   :  { %v93_v27 = vshrl.u32 %v92_v25, 5  ;;  %v94_v28 = vand.u32 31, %v92_v25  ;;  %vm194_vm1 = vcmp.gt.s32.totalorder %v193_v26, 0 }
  0x4f   :  { %v195_v52 = vsel %vm194_vm1, %v193_v26, 0  ;;  %vm184_vm1 = vcmp.le.f32.partialorder %v183_v17, 0.7853982 }
  0x50   :  { %v95_v31 = vsub.s32 32, %v94_v28  ;;  %v97_v33 = vshll.u32 %v1231_v32, %v94_v28  ;;  %v100_v35 = vshll.u32 %v1232_v34, %v94_v28  ;;  %v103_v37 = vshll.u32 %v1233_v36, %v94_v28 }
  0x51   :  { %v106_v39 = vshll.u32 %v1234_v38, %v94_v28  ;;  %v109_v41 = vshll.u32 %v1235_v40, %v94_v28  ;;  %vm112_vm2 = vcmp.lt.s32.totalorder %v93_v27, 1  ;;  %vm113_vm3 = vcmp.lt.s32.totalorder %v93_v27, 2 }
  0x52   :  { %v96_v42 = vshrl.u32 %v1231_v32, %v95_v31  ;;  %v98_v43 = vshrl.u32 %v1232_v34, %v95_v31  ;;  %v101_v44 = vshrl.u32 %v1233_v36, %v95_v31  ;;  %v104_v45 = vshrl.u32 %v1234_v38, %v95_v31 }
  0x53   :  { %v107_v46 = vshrl.u32 %v1235_v40, %v95_v31  ;;  %v110_v48 = vshrl.u32 %v1236_v47, %v95_v31  ;;  %vm114_vm4 = vcmp.lt.s32.totalorder %v93_v27, 3  ;;  %vm115_vm5 = vcmp.lt.s32.totalorder %v93_v27, 4 }
  0x54   :  { %v99_v49 = vor.u32 %v98_v43, %v97_v33  ;;  %v102_v50 = vor.u32 %v101_v44, %v100_v35  ;;  %v105_v51 = vor.u32 %v104_v45, %v103_v37  ;;  %v196_v55 = vshrl.u32 %v195_v52, 5 }
  0x55   :  { %v108_v53 = vor.u32 %v107_v46, %v106_v39  ;;  %v111_v54 = vor.u32 %v110_v48, %v109_v41  ;;  %v197_v56 = vand.u32 31, %v195_v52  ;;  %v231_v39 = vshll.u32 %v191_v30, 8 }
  0x56   :  { %v116_v57 = vsel %vm112_vm2, %v96_v42, %v99_v49  ;;  %v117_v58 = vsel %vm115_vm5, %v105_v51, 2102212464  ;;  %v120_v59 = vsel %vm112_vm2, %v99_v49, %v102_v50  ;;  %v124_v60 = vsel %vm112_vm2, %v102_v50, %v105_v51 }
  0x57   :  { %v118_v61 = vsel %vm114_vm4, %v102_v50, %v117_v58  ;;  %v121_v62 = vsel %vm115_vm5, %v108_v53, 920167782  ;;  %v125_v63 = vsel %vm115_vm5, %v111_v54, 1326507024  ;;  %v198_v0 = vsub.s32 32, %v197_v56 }
  0x58   :  { %v119_v2 = vsel %vm113_vm3, %v116_v57, %v118_v61  ;;  %v122_v3 = vsel %vm114_vm4, %v105_v51, %v121_v62  ;;  %v126_v4 = vsel %vm114_vm4, %v108_v53, %v125_v63  ;;  %v200_v5 = vshll.u32 %v1231_v32, %v197_v56 }
  0x59   :  { %v123_v6 = vsel %vm113_vm3, %v120_v59, %v122_v3  ;;  %v127_v7 = vsel %vm113_vm3, %v124_v60, %v126_v4  ;;  %v135_v8 = vmul.u32 %v1327_v29, %v119_v2  ;;  %v199_v14 = vshrl.u32 %v1231_v32, %v198_v0 }
  0x5a   :  { %v1355_v15 = vmul.u32.u64.low %v1327_v29, %v127_v7  ;;  %v1356_v16 = vmul.u32.u64.high %v1327_v29, %v127_v7, %v1355_v15  ;;  %v1359_v18 = vmul.u32.u64.low %v1327_v29, %v123_v6  ;;  %v1360_v19 = vmul.u32.u64.high %v1327_v29, %v123_v6, %v1359_v18 }
  0x5b   :  { %v201_v20 = vshrl.u32 %v1232_v34, %v198_v0  ;;  %v203_v21 = vshll.u32 %v1232_v34, %v197_v56  ;;  %v204_v22 = vshrl.u32 %v1233_v36, %v198_v0  ;;  %v206_v23 = vshll.u32 %v1233_v36, %v197_v56 }
  0x5c   :  { %v207_v25 = vshrl.u32 %v1234_v38, %v198_v0  ;;  %v209_v26 = vshll.u32 %v1234_v38, %v197_v56  ;;  %v210_v27 = vshrl.u32 %v1235_v40, %v198_v0  ;;  %v212_v28 = vshll.u32 %v1235_v40, %v197_v56 }
  0x5d   :  { %v202_v31 = vor.u32 %v201_v20, %v200_v5  ;;  %v205_v33 = vor.u32 %v204_v22, %v203_v21  ;;  %v213_v29 = vshrl.u32 %v1236_v47, %v198_v0  ;;  %vm215_vm6 = vcmp.lt.s32.totalorder %v196_v55, 1 }
  0x5e   :  { %vm137_vm7 = vc.u32 %v1356_v16, %v1359_v18  ;;  %v138_v35 = vadd.s32 1, %v1360_v19  ;;  %v208_v37 = vor.u32 %v207_v25, %v206_v23  ;;  %v211_v41 = vor.u32 %v210_v27, %v209_v26 }
  0x5f   :  { %v214_v42 = vor.u32 %v213_v29, %v212_v28  ;;  %vm216_vm8 = vcmp.lt.s32.totalorder %v196_v55, 2  ;;  %vm217_vm9 = vcmp.lt.s32.totalorder %v196_v55, 3  ;;  %vm218_vm10 = vcmp.lt.s32.totalorder %v196_v55, 4 }
  0x60   :  { %v139_v43 = vsel %vm137_vm7, %v138_v35, %v1360_v19  ;;  %v219_v44 = vsel %vm215_vm6, %v199_v14, %v202_v31  ;;  %v223_v45 = vsel %vm215_vm6, %v202_v31, %v205_v33  ;;  %v220_v48 = vsel %vm218_vm10, %v208_v37, 2102212464 }
  0x61   :  { %v140_v46 = vadd.s32 %v139_v43, %v135_v8  ;;  %v224_v49 = vsel %vm218_vm10, %v211_v41, 920167782  ;;  %v227_v50 = vsel %vm215_vm6, %v205_v33, %v208_v37  ;;  %v221_v51 = vsel %vm217_vm9, %v205_v33, %v220_v48 }
  0x62   :  { %v225_v52 = vsel %vm217_vm9, %v208_v37, %v224_v49  ;;  %v228_v24 = vsel %vm218_vm10, %v214_v42, 1326507024  ;;  %v222_v56 = vsel %vm216_vm8, %v219_v44, %v221_v51  ;;  %v136_v20 = vadd.s32 %v1359_v18, %v1356_v16  ;;  %v909_v49 = vld [vmem:[#allocation2 + $0x8] sm:$0xff] }
  0x63   :  { %v141_v30 = vadd.s32 536870912, %v140_v46  ;;  %v226_v53 = vsel %vm216_vm8, %v223_v45, %v225_v52  ;;  %v229_v54 = vsel %vm217_vm9, %v211_v41, %v228_v24  ;;  %v238_v0 = vmul.u32 %v231_v39, %v222_v56 }
  0x64   :  { %v230_v57 = vsel %vm216_vm8, %v227_v50, %v229_v54  ;;  %v1382_v58 = vmul.u32.u64.low %v231_v39, %v226_v53  ;;  %v1383_v59 = vmul.u32.u64.high %v231_v39, %v226_v53, %v1382_v58  ;;  %vm172_vm8 = vweird.f32 %v1312_v11 }
  0x65   :  { %v142_v60 = vshrl.u32 %v141_v30, 30  ;;  %v1385_v61 = vmul.u32.u64.low %v231_v39, %v230_v57  ;;  %v1386_v62 = vmul.u32.u64.high %v231_v39, %v230_v57, %v1385_v61 }
  0x66   :  { %v241_v2 = vadd.s32 1, %v1383_v59 }
  0x67   :  { %v143_v63 = vshll.u32 %v142_v60, 30  ;;  %vm240_vm11 = vc.u32 %v1386_v62, %v1382_v58  ;;  %v239_v44 = vadd.s32 %v1382_v58, %v1386_v62  ;;  %v166_v24 = vsub.s32 4, %v142_v60 }
  0x68   :  { %v242_v4 = vsel %vm240_vm11, %v241_v2, %v1383_v59 }
  0x69   :  { %v144_v3 = vsub.s32 %v140_v46, %v143_v63  ;;  %v243_v6 = vadd.s32 %v242_v4, %v238_v0  ;;  %v167_v59 = vsel %vm82_vm14, %v166_v24, %v142_v60 }
  0x6a   :  { %v169_v62 = vsel %vm1396_vm15, 0, %v167_v59 }
  0x6b   :  { %v146_v5 = vsub.s32 0, %v144_v3  ;;  %v244_v7 = vadd.s32 536870912, %v243_v6 }
  0x6d   :  { %v1045_v55 = vmin.u32 %v146_v5, %v144_v3  ;;  %v245_v14 = vshrl.u32 %v244_v7, 30 }
  0x6f   :  { %v148_v8 = vclz %v1045_v55  ;;  %v246_v19 = vshll.u32 %v245_v14, 30  ;;  %v269_v61 = vsub.s32 4, %v245_v14 }
  0x71   :  { %v1046_v15 = vadd.s32 4294967294, %v148_v8  ;;  %v247_v21 = vsub.s32 %v243_v6, %v246_v19  ;;  %v270_v2 = vsel %vm185_vm0, %v269_v61, %v245_v14  ;;  %v173_v8 = vand.u32 3, %v169_v62 }
  0x72   :  { %v272_v6 = vsel %vm184_vm1, 0, %v270_v2 }
  0x73   :  { %vm1047_vm12 = vcmp.lt.s32.totalorder %v1046_v15, 0  ;;  %v249_v27 = vsub.s32 0, %v247_v21  ;;  %vm175_vm4 = vcmp.eq.s32.totalorder %v173_v8, 0  ;;  %vm178_vm5 = vcmp.eq.s32.totalorder %v173_v8, 2 }
  0x74   :  { %v151_v22 = vsel %vm1047_vm12, 0, %v1046_v15  ;;  %v483_v15 = vadd.s32 3, %v272_v6  ;;  %v276_v14 = vand.u32 3, %v272_v6  ;;  %vm174_vm7 = vcmp.lt.s32.totalorder %v173_v8, 2 }
  0x75   :  { %v152_v23 = vsub.s32 32, %v151_v22  ;;  %v153_v25 = vshll.u32 %v144_v3, %v151_v22  ;;  %v156_v26 = vsub.s32 4294967266, %v151_v22  ;;  %v1049_v33 = vmin.u32 %v249_v27, %v247_v21 }
  0x76   :  { %v379_v3 = vadd.s32 3, %v169_v62  ;;  %v484_v17 = vand.u32 3, %v483_v15  ;;  %vm278_vm10 = vcmp.eq.s32.totalorder %v276_v14, 0  ;;  %vm281_vm11 = vcmp.eq.s32.totalorder %v276_v14, 2 }
  0x77   :  { %v154_v28 = vshrl.u32 %v136_v20, %v152_v23  ;;  %v157_v31 = vadd.s32 127, %v156_v26  ;;  %v251_v37 = vclz %v1049_v33 }
  0x78   :  { %v380_v7 = vand.u32 3, %v379_v3  ;;  %vm489_vm9 = vcmp.eq.s32.totalorder %v484_v17, 2  ;;  %vm486_vm12 = vcmp.eq.s32.totalorder %v484_v17, 0 }
  0x79   :  { %v155_v29 = vor.u32 %v154_v28, %v153_v25  ;;  %v158_v35 = vshll.u32 %v157_v31, 23  ;;  %v1050_v42 = vadd.s32 4294967294, %v251_v37 }
  0x7a   :  { %vm382_vm2 = vcmp.eq.s32.totalorder %v380_v7, 0  ;;  %vm385_vm3 = vcmp.eq.s32.totalorder %v380_v7, 2  ;;  %vm381_vm6 = vcmp.lt.s32.totalorder %v380_v7, 2 }
  0x7b   :  { %v159_v39 = vor.u32 4788187, %v158_v35  ;;  %v162_v41 = vcvt.s32.f32 %v155_v29  ;;  %vm1051_vm13 = vcmp.lt.s32.totalorder %v1050_v42, 0 }
  0x7c   :  { %v254_v16 = vsel %vm1051_vm13, 0, %v1050_v42  ;;  %vm485_vm13 = vcmp.lt.s32.totalorder %v484_v17, 2 }
  0x7d   :  { %v160_v43 = vand.u32 2147483647, %v159_v39  ;;  %v255_v45 = vsub.s32 32, %v254_v16  ;;  %v256_v46 = vshll.u32 %v247_v21, %v254_v16  ;;  %v259_v48 = vsub.s32 4294967266, %v254_v16 }
  0x7f   :  { %v163_v18 = vmul.f32 %v162_v41, %v160_v43  ;;  %v257_v51 = vshrl.u32 %v239_v44, %v255_v45  ;;  %v260_v52 = vadd.s32 127, %v259_v48 }
  0x81   :  { %v164_v50 = vxor.u32 2147483648, %v163_v18  ;;  %v258_v53 = vor.u32 %v257_v51, %v256_v46  ;;  %v261_v54 = vshll.u32 %v260_v52, 23  ;;  %v75_v51 = vsub.s32 0, %v1303_v1 }
  0x83   :  { %v165_v30 = vsel %vm82_vm14, %v164_v50, %v163_v18  ;;  %v262_v57 = vor.u32 4788187, %v261_v54  ;;  %v265_v58 = vcvt.s32.f32 %v258_v53  ;;  %vm277_vm14 = vcmp.lt.s32.totalorder %v276_v14, 2  ;;  %v70_v50 = vld [vmem:[#allocation7] sm:$0x1] }
  0x84   :  { %v168_v56 = vsel %vm1396_vm15, %v1312_v11, %v165_v30  ;;  %vm275_vm15 = vweird.f32 %v1315_v12  ;;  %v71_v11 = vsub.f32 0.0, %v70_v50 }
  0x85   :  { %1115 = vcosq.f32 %v168_v56  ;;  %v263_v13 = vand.u32 2147483647, %v262_v57 }
  0x86   :  { %1117 = vsinq.f32 %v168_v56  ;;  %v76_v52 = vrot.slane %v71_v11, %v75_v51 }
  0x87   :  { %v266_v63 = vmul.f32 %v265_v58, %v263_v13 }
  0x88   :  { %v1418_v24 = vmul.f32 %v76_v52, %v1307_v9  ;;  %v1421_v30 = vmul.f32 %v76_v52, %v1309_v10 }
  0x89   :  { %v267_v0 = vxor.u32 2147483648, %v266_v63 }
  0x8a   :  { %v497_v53 = vand.u32 2139095040, %v1418_v24  ;;  %v600_v54 = vand.u32 2139095040, %v1421_v30  ;;  %v494_v10 = vand.u32 2147483647, %v1418_v24 }
  0x8b   :  { %v268_v4 = vsel %vm185_vm0, %v267_v0, %v266_v63  ;;  %vm910_vm0 = vcmask 130048  }
  0x8c   :  { %v271_v5 = vsel %vm184_vm1, %v1315_v12, %v268_v4  ;;  %v908_v12 = vld [vmem:[#allocation2] sm:$0xff]  ;;  %v498_v56 = vshrl.u32 %v497_v53, 23  ;;  %v601_v57 = vshrl.u32 %v600_v54, 23  ;;  %v501_v8 = vand.u32 8388607, %v494_v10 }
  0x8d   :  { %1119 = vcosq.f32 %v271_v5 }
  0x8e   :  { %1121 = vsinq.f32 %v271_v5  ;;  %v1060_v58 = vadd.s32 4294967169, %v498_v56  ;;  %v1064_v59 = vadd.s32 4294967169, %v601_v57  ;;  %v597_v5 = vand.u32 2147483647, %v1421_v30 }
  0x8f   :  { %v1116_v60 = vpop.eup %1115 }
  0x90   :  { %v1118_v55 = vpop.eup %1117  ;;  %v179_v20 = vxor.u32 2147483648, %v1116_v60  ;;  %v504_v13 = vadd.s32 1, %v1060_v58  ;;  %v607_v61 = vadd.s32 1, %v1064_v59 }
  0x91   :  { %v176_v19 = vxor.u32 2147483648, %v1118_v55 }
  0x92   :  { %v387_v22 = vsel %vm385_vm3, %v179_v20, %v1118_v55  ;;  %v180_v25 = vsel %vm178_vm5, %v179_v20, %v1118_v55  ;;  %vm505_vm1 = vcmp.gt.s32.totalorder %v504_v13, 0 }
  0x93   :  { %v384_v21 = vsel %vm382_vm2, %v1116_v60, %v176_v19  ;;  %v177_v23 = vsel %vm175_vm4, %v1116_v60, %v176_v19  ;;  %vm608_vm2 = vcmp.gt.s32.totalorder %v607_v61, 0  ;;  %v506_v1 = vsel %vm505_vm1, %v504_v13, 0 }
  0x94   :  { %v388_v31 = vsel %vm381_vm6, %v384_v21, %v387_v22  ;;  %v181_v33 = vsel %vm174_vm7, %v177_v23, %v180_v25  ;;  %v609_v62 = vsel %vm608_vm2, %v607_v61, 0  ;;  %v508_v63 = vand.u32 31, %v506_v1 }
  0x95   :  { %v389_v39 = vsel %vm172_vm8, nan, %v388_v31  ;;  %v182_v42 = vsel %vm172_vm8, nan, %v181_v33  ;;  %v611_v9 = vand.u32 31, %v609_v62  ;;  %v1434_v6 = vshrl.u32 %v506_v1, 5 }
  0x96   :  { %v1425_v0 = vsub.s32 32, %v508_v63  ;;  %v520_v3 = vshll.u32 %v1234_v38, %v508_v63  ;;  %v523_v60 = vshll.u32 %v1235_v40, %v508_v63  ;;  %v511_v15 = vshll.u32 %v1231_v32, %v508_v63 }
  0x97   :  { %v1120_v26 = vpop.eup %1119  ;;  %v1428_v2 = vsub.s32 32, %v611_v9  ;;  %v623_v7 = vshll.u32 %v1234_v38, %v611_v9  ;;  %v514_v17 = vshll.u32 %v1232_v34, %v508_v63  ;;  %v517_v21 = vshll.u32 %v1233_v36, %v508_v63 }
  0x98   :  { %v1122_v27 = vpop.eup %1121  ;;  %v282_v28 = vxor.u32 2147483648, %v1120_v26  ;;  %v521_v4 = vshrl.u32 %v1235_v40, %v1425_v0  ;;  %v524_v55 = vshrl.u32 %v1236_v47, %v1425_v0  ;;  %v512_v19 = vshrl.u32 %v1232_v34, %v1425_v0 }
  0x99   :  { %v279_v29 = vxor.u32 2147483648, %v1122_v27  ;;  %v624_v20 = vshrl.u32 %v1235_v40, %v1428_v2  ;;  %v515_v14 = vshrl.u32 %v1233_v36, %v1425_v0  ;;  %v518_v22 = vshrl.u32 %v1234_v38, %v1425_v0 }
  0x9a   :  { %v491_v35 = vsel %vm489_vm9, %v282_v28, %v1122_v27  ;;  %v283_v37 = vsel %vm281_vm11, %v282_v28, %v1122_v27  ;;  %v522_v23 = vor.u32 %v521_v4, %v520_v3  ;;  %v1453_v25 = vshrl.u32 %v609_v62, 5 }
  0x9b   :  { %v488_v41 = vsel %vm486_vm12, %v1120_v26, %v279_v29  ;;  %v280_v43 = vsel %vm278_vm10, %v1120_v26, %v279_v29  ;;  %v626_v26 = vshll.u32 %v1235_v40, %v611_v9  ;;  %v627_v27 = vshrl.u32 %v1236_v47, %v1428_v2 }
  0x9c   :  { %v492_v44 = vsel %vm485_vm13, %v488_v41, %v491_v35  ;;  %v284_v16 = vsel %vm277_vm14, %v280_v43, %v283_v37  ;;  %v525_v28 = vor.u32 %v524_v55, %v523_v60  ;;  %vm529_vm3 = vcmp.lt.s32.totalorder %v1434_v6, 4 }
  0x9d   :  { %v493_v18 = vsel %vm275_vm15, nan, %v492_v44  ;;  %v285_v45 = vsel %vm275_vm15, nan, %v284_v16  ;;  %v614_v31 = vshll.u32 %v1231_v32, %v611_v9  ;;  %v615_v33 = vshrl.u32 %v1232_v34, %v1428_v2 }
  0x9e   :  { %v1078_v46 = vpack.c.bf16 %v493_v18, %v389_v39  ;;  %v1080_v48 = vpack.c.bf16 %v285_v45, %v182_v42  ;;  %v617_v29 = vshll.u32 %v1232_v34, %v611_v9  ;;  %v618_v35 = vshrl.u32 %v1233_v36, %v1428_v2 }
  0x9f   :  { %v620_v37 = vshll.u32 %v1233_v36, %v611_v9  ;;  %v621_v40 = vshrl.u32 %v1234_v38, %v1428_v2  ;;  %v513_v39 = vor.u32 %v512_v19, %v511_v15  ;;  %v516_v47 = vor.u32 %v515_v14, %v514_v17 }
  0xa0   :  { %1079 = vmatprep.subr.bf16.mxu0 %v1078_v46  ;;  %1082 = vmatprep.subr.bf16.mxu1 %v1078_v46  ;;  %v625_v41 = vor.u32 %v624_v20, %v623_v7  ;;  %v519_v42 = vor.u32 %v518_v22, %v517_v21  ;;  %v604_v43 = vand.u32 8388607, %v597_v5  ;;  %v628_v44 = vor.u32 %v627_v27, %v626_v26 }
  0xa1   :  { %1081 = vmatpush1.bf16.msra.mxu0 %v1080_v48  ;;  %1083 = vmatpush1.bf16.msra.mxu1 %v1080_v48  ;;  %vm632_vm4 = vcmp.lt.s32.totalorder %v1453_v25, 4  ;;  %v502_v16 = vor.u32 8388608, %v501_v8  ;;  %vm526_vm5 = vcmp.lt.s32.totalorder %v1434_v6, 1  ;;  %vm528_vm6 = vcmp.lt.s32.totalorder %v1434_v6, 3 }
  0xa2   :  { %v535_v34 = vsel %vm529_vm3, %v522_v23, 920167782  ;;  %v539_v36 = vsel %vm529_vm3, %v525_v28, 1326507024  ;;  %v616_v38 = vor.u32 %v615_v33, %v614_v31  ;;  %v619_v18 = vor.u32 %v618_v35, %v617_v29 }
  0xa3   :  { %v622_v45 = vor.u32 %v621_v40, %v620_v37  ;;  %vm527_vm7 = vcmp.lt.s32.totalorder %v1434_v6, 2  ;;  %vm629_vm8 = vcmp.lt.s32.totalorder %v1453_v25, 1  ;;  %vm631_vm9 = vcmp.lt.s32.totalorder %v1453_v25, 3 }
  0xa4   :  { %1076 = vmatmul.mubr.msk.f32.vlgmr.msra.gmra.mrb[0].mxu0 %vm910_vm0, %v908_v12  ;;  %1077 = vmatmul.mubr.msk.f32.vlgmr.msra.gmra.mrb[0].mxu1 %vm910_vm0, %v909_v49  ;;  %v638_v46 = vsel %vm632_vm4, %v625_v41, 920167782  ;;  %v534_v48 = vsel %vm526_vm5, %v513_v39, %v516_v47  ;;  %v536_v12 = vsel %vm528_vm6, %v519_v42, %v535_v34  ;;  %v605_v49 = vor.u32 8388608, %v604_v43 }
  0xa5   :  { %v642_v50 = vsel %vm632_vm4, %v628_v44, 1326507024  ;;  %v538_v11 = vsel %vm526_vm5, %v516_v47, %v519_v42  ;;  %v540_v51 = vsel %vm528_vm6, %v522_v23, %v539_v36  ;;  %v542_v52 = vshll.u32 %v502_v16, 8 }
  0xa6   :  { %vm630_vm10 = vcmp.lt.s32.totalorder %v1453_v25, 2  ;;  %v637_v53 = vsel %vm629_vm8, %v616_v38, %v619_v18  ;;  %v639_v54 = vsel %vm631_vm9, %v622_v45, %v638_v46  ;;  %v537_v56 = vsel %vm527_vm7, %v534_v48, %v536_v12 }
  0xa7   :  { %v641_v57 = vsel %vm629_vm8, %v619_v18, %v622_v45  ;;  %v643_v58 = vsel %vm631_vm9, %v625_v41, %v642_v50  ;;  %v541_v59 = vsel %vm527_vm7, %v538_v11, %v540_v51  ;;  %v645_v13 = vshll.u32 %v605_v49, 8 }
  0xa8   :  { %v640_v61 = vsel %vm630_vm10, %v637_v53, %v639_v54  ;;  %v1507_v1 = vmul.u32.u64.low %v542_v52, %v537_v56  ;;  %v1508_v62 = vmul.u32.u64.high %v542_v52, %v537_v56, %v1507_v1  ;;  %v644_v63 = vsel %vm630_vm10, %v641_v57, %v643_v58 }
  0xa9   :  { %v510_v9 = vshrl.u32 %v1231_v32, %v1425_v0  ;;  %v1514_v3 = vmul.u32.u64.low %v542_v52, %v541_v59  ;;  %v1515_v4 = vmul.u32.u64.high %v542_v52, %v541_v59, %v1514_v3  ;;  %v531_v60 = vsel %vm529_vm3, %v519_v42, 2102212464 }
  0xaa   :  { %v1519_v55 = vmul.u32.u64.low %v645_v13, %v640_v61  ;;  %v1520_v7 = vmul.u32.u64.high %v645_v13, %v640_v61, %v1519_v55  ;;  %v613_v8 = vshrl.u32 %v1231_v32, %v1428_v2  ;;  %v634_v20 = vsel %vm632_vm4, %v622_v45, 2102212464 }
  0xab   :  { %v1524_v15 = vmul.u32.u64.low %v645_v13, %v644_v63  ;;  %v1525_v19 = vmul.u32.u64.high %v645_v13, %v644_v63, %v1524_v15  ;;  %v530_v0 = vsel %vm526_vm5, %v510_v9, %v513_v39  ;;  %v532_v17 = vsel %vm528_vm6, %v516_v47, %v531_v60 }
  0xac   :  { %v633_v14 = vsel %vm629_vm8, %v613_v8, %v616_v38  ;;  %v635_v21 = vsel %vm631_vm9, %v619_v18, %v634_v20  ;;  %v533_v32 = vsel %vm527_vm7, %v530_v0, %v532_v17  ;;  %v552_v2 = vadd.s32 1, %v1508_v62 }
  0xad   :  { %vm551_vm11 = vc.u32 %v1515_v4, %v1507_v1  ;;  %v636_v22 = vsel %vm630_vm10, %v633_v14, %v635_v21  ;;  %v655_v23 = vadd.s32 1, %v1520_v7  ;;  %v549_v26 = vmul.u32 %v542_v52, %v533_v32 }
  0xae   :  { %vm654_vm12 = vc.u32 %v1525_v19, %v1519_v55  ;;  %v553_v27 = vsel %vm551_vm11, %v552_v2, %v1508_v62  ;;  %v652_v28 = vmul.u32 %v645_v13, %v636_v22  ;;  %v550_v49 = vadd.s32 %v1507_v1, %v1515_v4 }
  0xaf   :  { %v656_v31 = vsel %vm654_vm12, %v655_v23, %v1520_v7  ;;  %v554_v33 = vadd.s32 %v553_v27, %v549_v26  ;;  %v653_v51 = vadd.s32 %v1519_v55, %v1525_v19  ;;  %vm496_vm15 = vcmp.lt.s32.totalorder %v1418_v24, 0 }
  0xb0   :  { %v657_v6 = vadd.s32 %v656_v31, %v652_v28  ;;  %vm599_vm0 = vcmp.lt.s32.totalorder %v1421_v30, 0  ;;  %vm495_vm1 = vcmp.le.f32.partialorder %v494_v10, 0.7853982  ;;  %vm598_vm2 = vcmp.le.f32.partialorder %v597_v5, 0.7853982 }
  0xb1   :  { %v555_v29 = vadd.s32 536870912, %v554_v33 }
  0xb2   :  { %v658_v35 = vadd.s32 536870912, %v657_v6 }
  0xb3   :  { %v556_v37 = vshrl.u32 %v555_v29, 30 }
  0xb4   :  { %v659_v40 = vshrl.u32 %v658_v35, 30 }
  0xb5   :  { %v557_v39 = vshll.u32 %v556_v37, 30  ;;  %v580_v17 = vsub.s32 4, %v556_v37 }
  0xb6   :  { %v660_v47 = vshll.u32 %v659_v40, 30  ;;  %v683_v14 = vsub.s32 4, %v659_v40 }
  0xb7   :  { %v558_v25 = vsub.s32 %v554_v33, %v557_v39  ;;  %v581_v32 = vsel %vm496_vm15, %v580_v17, %v556_v37 }
  0xb8   :  { %v661_v41 = vsub.s32 %v657_v6, %v660_v47  ;;  %v684_v2 = vsel %vm599_vm0, %v683_v14, %v659_v40  ;;  %v583_v22 = vsel %vm495_vm1, 0, %v581_v32 }
  0xb9   :  { %v560_v42 = vsub.s32 0, %v558_v25  ;;  %v686_v23 = vsel %vm598_vm2, 0, %v684_v2  ;;  %v793_v10 = vadd.s32 3, %v583_v22  ;;  %v587_v5 = vand.u32 3, %v583_v22 }
  0xba   :  { %v663_v43 = vsub.s32 0, %v661_v41  ;;  %v897_v26 = vadd.s32 3, %v686_v23  ;;  %v690_v29 = vand.u32 3, %v686_v23 }
  0xbb   :  { %v1061_v44 = vmin.u32 %v560_v42, %v558_v25  ;;  %v794_v33 = vand.u32 3, %v793_v10  ;;  %vm589_vm3 = vcmp.eq.s32.totalorder %v587_v5, 0  ;;  %vm592_vm4 = vcmp.eq.s32.totalorder %v587_v5, 2 }
  0xbc   :  { %v1065_v16 = vmin.u32 %v663_v43, %v661_v41  ;;  %v898_v35 = vand.u32 3, %v897_v26  ;;  %vm692_vm7 = vcmp.eq.s32.totalorder %v690_v29, 0  ;;  %vm695_vm8 = vcmp.eq.s32.totalorder %v690_v29, 2 }
  0xbd   :  { %v562_v34 = vclz %v1061_v44  ;;  %vm796_vm5 = vcmp.eq.s32.totalorder %v794_v33, 0  ;;  %vm799_vm6 = vcmp.eq.s32.totalorder %v794_v33, 2  ;;  %vm588_vm11 = vcmp.lt.s32.totalorder %v587_v5, 2 }
  0xbe   :  { %v665_v36 = vclz %v1065_v16  ;;  %vm900_vm9 = vcmp.eq.s32.totalorder %v898_v35, 0  ;;  %vm903_vm10 = vcmp.eq.s32.totalorder %v898_v35, 2  ;;  %vm795_vm12 = vcmp.lt.s32.totalorder %v794_v33, 2 }
  0xbf   :  { %v1062_v38 = vadd.s32 4294967294, %v562_v34 }
  0xc0   :  { %v1066_v18 = vadd.s32 4294967294, %v665_v36 }
  0xc1   :  { %vm1063_vm13 = vcmp.lt.s32.totalorder %v1062_v38, 0 }
  0xc2   :  { %vm1067_vm14 = vcmp.lt.s32.totalorder %v1066_v18, 0  ;;  %v565_v45 = vsel %vm1063_vm13, 0, %v1062_v38  ;;  %vm691_vm13 = vcmp.lt.s32.totalorder %v690_v29, 2 }
  0xc3   :  { %v668_v46 = vsel %vm1067_vm14, 0, %v1066_v18  ;;  %v570_v48 = vsub.s32 4294967266, %v565_v45  ;;  %v566_v50 = vsub.s32 32, %v565_v45  ;;  %v567_v54 = vshll.u32 %v558_v25, %v565_v45 }
  0xc4   :  { %v673_v12 = vsub.s32 4294967266, %v668_v46  ;;  %v669_v52 = vsub.s32 32, %v668_v46  ;;  %v670_v58 = vshll.u32 %v661_v41, %v668_v46  ;;  %vm899_vm14 = vcmp.lt.s32.totalorder %v898_v35, 2 }
  0xc5   :  { %v571_v11 = vadd.s32 127, %v570_v48  ;;  %v568_v56 = vshrl.u32 %v550_v49, %v566_v50 }
  0xc6   :  { %v674_v53 = vadd.s32 127, %v673_v12  ;;  %v671_v59 = vshrl.u32 %v653_v51, %v669_v52 }
  0xc7   :  { %v572_v57 = vshll.u32 %v571_v11, 23  ;;  %v569_v61 = vor.u32 %v568_v56, %v567_v54 }
  0xc8   :  { %v675_v13 = vshll.u32 %v674_v53, 23  ;;  %v672_v63 = vor.u32 %v671_v59, %v670_v58 }
  0xc9   :  { %v573_v62 = vor.u32 4788187, %v572_v57  ;;  %v576_v60 = vcvt.s32.f32 %v569_v61 }
  0xca   :  { %v676_v9 = vor.u32 4788187, %v675_v13  ;;  %v679_v1 = vcvt.s32.f32 %v672_v63 }
  0xcb   :  { %v574_v3 = vand.u32 2147483647, %v573_v62 }
  0xcc   :  { %v677_v7 = vand.u32 2147483647, %v676_v9 }
  0xcd   :  { %v577_v4 = vmul.f32 %v576_v60, %v574_v3 }
  0xce   :  { %v680_v8 = vmul.f32 %v679_v1, %v677_v7 }
  0xcf   :  { %v578_v15 = vxor.u32 2147483648, %v577_v4 }
  0xd0   :  { %v681_v55 = vxor.u32 2147483648, %v680_v8 }
  0xd1   :  { %v579_v19 = vsel %vm496_vm15, %v578_v15, %v577_v4  ;;  %vm586_vm15 = vweird.f32 %v1418_v24 }
  0xd2   :  { %v682_v20 = vsel %vm599_vm0, %v681_v55, %v680_v8  ;;  %v582_v0 = vsel %vm495_vm1, %v1418_v24, %v579_v19  ;;  %vm689_vm0 = vweird.f32 %v1421_v30 }
  0xd3   :  { %v685_v21 = vsel %vm598_vm2, %v1421_v30, %v682_v20  ;;  %1123 = vcosq.f32 %v582_v0 }
  0xd4   :  { %1125 = vsinq.f32 %v582_v0 }
  0xd5   :  { %1127 = vcosq.f32 %v685_v21 }
  0xd6   :  { %1129 = vsinq.f32 %v685_v21 }
  0xdd   :  { %v1124_v27 = vpop.eup %1123 }
  0xde   :  { %v1126_v28 = vpop.eup %1125  ;;  %v593_v39 = vxor.u32 2147483648, %v1124_v27 }
  0xdf   :  { %v1128_v31 = vpop.eup %1127  ;;  %v590_v47 = vxor.u32 2147483648, %v1126_v28 }
  0xe0   :  { %v1130_v6 = vpop.eup %1129  ;;  %v696_v40 = vxor.u32 2147483648, %v1128_v31  ;;  %v594_v25 = vsel %vm592_vm4, %v593_v39, %v1126_v28  ;;  %v801_v43 = vsel %vm799_vm6, %v593_v39, %v1126_v28 }
  0xe1   :  { %v693_v37 = vxor.u32 2147483648, %v1130_v6  ;;  %v591_v41 = vsel %vm589_vm3, %v1124_v27, %v590_v47  ;;  %v798_v42 = vsel %vm796_vm5, %v1124_v27, %v590_v47 }
  0xe2   :  { %v697_v16 = vsel %vm695_vm8, %v696_v40, %v1130_v6  ;;  %v905_v36 = vsel %vm903_vm10, %v696_v40, %v1130_v6  ;;  %v595_v38 = vsel %vm588_vm11, %v591_v41, %v594_v25  ;;  %v802_v18 = vsel %vm795_vm12, %v798_v42, %v801_v43 }
  0xe3   :  { %v694_v44 = vsel %vm692_vm7, %v1128_v31, %v693_v37  ;;  %v902_v34 = vsel %vm900_vm9, %v1128_v31, %v693_v37  ;;  %v596_v48 = vsel %vm586_vm15, nan, %v595_v38  ;;  %v803_v12 = vsel %vm586_vm15, nan, %v802_v18 }
  0xe4   :  { %v698_v45 = vsel %vm691_vm13, %v694_v44, %v697_v16  ;;  %v906_v46 = vsel %vm899_vm14, %v902_v34, %v905_v36 }
  0xe5   :  { %v699_v49 = vsel %vm689_vm0, nan, %v698_v45  ;;  %v907_v50 = vsel %vm689_vm0, nan, %v906_v46 }
 0x177   :  { %v983_v11 = vpop.f32.mrb[0].mxu0  ;;  %v989_v51 = vpop.f32.mrb[0].mxu1 }
 0x178   :  { %v985_v52 = vpop.f32.mrb[1].mxu0  ;;  %v994_v53 = vmul.f32 %v983_v11, %v596_v48  ;;  %v1010_v54 = vmul.f32 %v983_v11, %v803_v12  ;;  %v991_v56 = vpop.f32.mrb[1].mxu1  ;;  %v995_v57 = vmul.f32 %v989_v51, %v699_v49  ;;  %v1011_v58 = vmul.f32 %v989_v51, %v907_v50 }
 0x179   :  { %v996_v59 = vmul.f32 %v985_v52, %v803_v12  ;;  %v1008_v24 = vmul.f32 %v985_v52, %v596_v48  ;;  %v997_v13 = vmul.f32 %v991_v56, %v907_v50  ;;  %v1009_v30 = vmul.f32 %v991_v56, %v699_v49 }
 0x17b   :  { %v998_v61 = vsub.f32 %v994_v53, %v996_v59  ;;  %v1012_v62 = vadd.f32 %v1010_v54, %v1008_v24  ;;  %v999_v63 = vsub.f32 %v995_v57, %v997_v13  ;;  %v1013_v9 = vadd.f32 %v1011_v58, %v1009_v30 }
 0x17d   :  { %v1000_v3 = vadd.f32 %v999_v63, %v998_v61  ;;  %v1014_v60 = vadd.f32 %v1013_v9, %v1012_v62 }
 0x17f   :  { %v1001_v7 = vrot.slane %v1000_v3, 4  ;;  %v1015_v1 = vrot.slane %v1014_v60, 4 }
 0x181   :  { %v1002_v4 = vadd.f32 %v1001_v7, %v1000_v3  ;;  %v1016_v8 = vadd.f32 %v1015_v1, %v1014_v60 }
 0x183   :  { %v1003_v15 = vrot.slane %v1002_v4, 2  ;;  %v1017_v55 = vrot.slane %v1016_v8, 2 }
 0x185   :  { %v1004_v19 = vadd.f32 %v1003_v15, %v1002_v4  ;;  %v1018_v20 = vadd.f32 %v1017_v55, %v1016_v8 }
 0x187   :  { %v1005_v0 = vrot.slane %v1004_v19, 1  ;;  %v1019_v17 = vrot.slane %v1018_v20, 1 }
 0x189   :  { %v1006_v14 = vadd.f32 %v1005_v0, %v1004_v19  ;;  %v1020_v21 = vadd.f32 %v1019_v17, %v1018_v20 }
 0x18b   :  { %1007 = vst [vmem:[#allocation8] sm:$0x1] %v1006_v14  ;;  %1022 = vst [vmem:[#allocation8 + $0x1] sm:$0x1] %v1020_v21 }
 0x18c   :  { %1208 = shalt.err (!%p1205_p0)
}
 0x18d   :  { %s1209_s27 = scalar_lea.hbm %s1574_s3, 32 }
 0x18e   :  { %p1210_p1 = scmp.ne.s32.totalorder %s1574_s3, %s1209_s27  ;;  %p1213_p2 = scmp.lt.u32.totalorder %s1209_s27, %s1574_s3 }
 0x190   :  { %p1215_p3 = pnand %p1213_p2, %p1210_p1 }
 0x192   :  { %1218 = shalt.err (!%p1215_p3)
}
 0x193   :  { %s1238_s5 = smov 16   ;;  %s1239_s6 = smov 1  }
 0x194   :  { %1034 = dma.vmem_to_hbm [thread:$0]  %s1029_s23, 32, %s1574_s3, [#allocation4], %s1238_s5, %s1238_s5, %s1239_s6  }
 0x195   :  { %1223 = dma.done.wait [#allocation4], 32  }
 0x196   :  { %1224 = vsyncadd [#allocation4], 4294967264 }
 0x197   :  { %1038 = vsyncpa [#allocation3], 1 }
 0x198   :  { %1039 = vsyncpa [#allocation6], 1 }
 0x199   :  { %1040 = vsyncpa [#allocation4], 1 }

</bundles_post_ra>
